<compile_context>
chip_gen: v7x
topology: tpu7x:2x2x1
jax: 0.10.0
libtpu: 0.0.40
codegen_flags: <defaults>
</compile_context>

<pallas_src>
from typing import NamedTuple

import jax
import jax.numpy as jnp
from jax import lax
from jax.experimental import pallas as pl
from jax.experimental.pallas import tpu as pltpu


def _round_up(x, m):
    return (x + m - 1) // m * m


def _vmem_capacity_bytes():
    # Generation-aware VMEM capacity (v5e/v6e: 128 MiB, v7x: 64 MiB per TC).
    try:
        return int(pltpu.get_tpu_info().vmem_capacity_bytes)
    except Exception:
        return 64 * 2**20


def _choose_pack(E, vtot_pad, max_table_bytes=16 * 2**20):
    """Tokens packed per 128-lane output row: largest power of two <= 128 // E,
    shrunk if the replicated block-diagonal table would exceed max_table_bytes."""
    pack = 1
    while pack * 2 <= max(1, 128 // E):
        pack *= 2
    while pack > 1 and pack * vtot_pad * _round_up(pack * E, 128) * 4 > max_table_bytes:
        pack //= 2
    return pack


class PackedEmbeddingTable(NamedTuple):
    table: jax.Array      # [pack*vtot_pad, out_cols] block-diagonal, float32
    char_size: int
    pos_size: int
    char_dim: int
    pos_dim: int
    emb_dim: int          # E = char_dim + 2*pos_dim
    vtot_pad: int
    pack: int
    out_cols: int
    slot_stride: int      # out_cols // pack  (>= emb_dim)


def prepare_embedding_tables(char_table, pos_table, dtype=jnp.float32):
    """Build the packed block-diagonal lookup table ONCE (hoist out of the forward).

    Layout (per token slot s of `pack` slots):
      rows [s*Vtot_pad + 0      , s*Vtot_pad + vc      ) -> char table  at cols [s*stride          , s*stride + dc)
      rows [s*Vtot_pad + vc     , s*Vtot_pad + vc +  vp) -> pos  table  at cols [s*stride + dc     , s*stride + dc + dp)
      rows [s*Vtot_pad + vc + vp, s*Vtot_pad + vc + 2vp) -> pos  table  at cols [s*stride + dc + dp, s*stride + E)
    so a multi-hot over 3*pack pre-offset indices @ this table yields the concatenated
    [char | pos1 | pos2] embeddings of `pack` tokens in one lane-dense row.
    """
    vc, dc = char_table.shape
    vp, dp = pos_table.shape
    E = dc + 2 * dp
    vtot_pad = _round_up(vc + 2 * vp, 128)
    pack = _choose_pack(E, vtot_pad)
    out_cols = _round_up(pack * E, 128)
    slot_stride = out_cols // pack

    single = jnp.zeros((vtot_pad, E), dtype)
    single = single.at[:vc, :dc].set(char_table.astype(dtype))
    single = single.at[vc:vc + vp, dc:dc + dp].set(pos_table.astype(dtype))
    single = single.at[vc + vp:vc + 2 * vp, dc + dp:].set(pos_table.astype(dtype))

    table = jnp.zeros((pack * vtot_pad, out_cols), dtype)
    for s in range(pack):
        table = table.at[s * vtot_pad:(s + 1) * vtot_pad,
                         s * slot_stride:s * slot_stride + E].set(single)

    return PackedEmbeddingTable(table, vc, vp, dc, dp, E, vtot_pad, pack, out_cols,
                                slot_stride)


def _embedding_kernel(idx_ref, table_ref, out_ref):
    """One token tile: multi-hot [T, K] @ block-diagonal table [K, out_cols] on the MXU.

    idx_ref holds, per packed output row, 3*pack pre-offset row indices into the
    combined table (char / pos1 / pos2 for each of the `pack` token slots).  Summing
    their one-hots gives a multi-hot whose single matmul lands every embedding in its
    own disjoint column slice -> one full-tile, lane-dense store.
    Out-of-range / negative ids match no table row and yield zeros.
    """
    T, ncols = idx_ref.shape
    K = table_ref.shape[0]
    idx = idx_ref[...]                                           # [T, 3*pack] int32
    iota = lax.broadcasted_iota(jnp.int32, (T, K), 1)
    hot = (idx[:, 0:1] == iota).astype(jnp.float32)
    for c in range(1, ncols):                                    # small static unroll
        hot = hot + (idx[:, c:c + 1] == iota).astype(jnp.float32)
    out_ref[...] = jnp.dot(hot, table_ref[...],
                           preferred_element_type=jnp.float32)


def embedding_forward(sentences, poses1, poses2, lengths,
                      char_table=None, pos_table=None, prepared=None,
                      max_len=None, token_tile=None):
    """Pallas equivalent of Embedding.forward.

    Returns (embedds [B, L, E] float32, mask [B, 1, L] bool) with
    E = char_dim + 2 * pos_dim and L = max_len (max(lengths) if max_len is None --
    that forces a device->host sync and a recompile per distinct length; prefer a
    static / bucketed max_len).  Pass `prepared = prepare_embedding_tables(...)`
    (built once and cached) to avoid re-materializing the padded tables per call.
    """
    if prepared is None:
        prepared = prepare_embedding_tables(char_table, pos_table)

    if max_len is None:
        # Exact torch semantics: sentences[:, :max(lengths)].
        max_len = int(jax.device_get(jnp.max(lengths)))

    sentences = sentences[:, :max_len].astype(jnp.int32)
    poses1 = poses1[:, :max_len].astype(jnp.int32)
    poses2 = poses2[:, :max_len].astype(jnp.int32)

    B, L = sentences.shape
    vc, vp = prepared.char_size, prepared.pos_size
    E, pack = prepared.emb_dim, prepared.pack
    vtot_pad, out_cols = prepared.vtot_pad, prepared.out_cols
    slot_stride = prepared.slot_stride
    K = pack * vtot_pad

    # Padding mask: one elementwise op, leave it to XLA (no extra kernel output block).
    mask = (sentences != 0)[:, None, :]

    # ---- token tiling --------------------------------------------------------------
    N = B * L
    grain = 8 * pack                      # 8 sublanes * pack tokens per output row
    work = _round_up(max(N, 1), grain)
    cap = _vmem_capacity_bytes()

    if token_tile is None:
        # Size the tile from the VMEM budget: big tiles amortize the ~0.35us/step
        # pipeline overhead.  Cap at 2048 tokens, and keep >= 2 grid steps so the
        # "parallel" axis can still split across the 2 TensorCores on v7x.
        budget = max(cap // 2, 8 * 2**20)
        table_bytes = 2 * K * out_cols * 4                      # assume double-buffered
        per_row = 4 * (2 * 3 * pack + 2 * out_cols + K)         # idx/out tiles + multi-hot
        rows = max((budget - table_bytes) // per_row, 8)
        token_tile = int(max(min(rows * pack, 2048), grain))
        token_tile = min(_round_up(token_tile, grain), work)
        if work // token_tile < 2 and work >= 2 * grain:
            token_tile = _round_up(-(-work // 2), grain)
    else:
        token_tile = min(_round_up(max(int(token_tile), grain), grain), work)

    n_pad_tokens = _round_up(work, token_tile)
    n_rows = n_pad_tokens // pack
    tile_rows = token_tile // pack
    grid = n_pad_tokens // token_tile

    # ---- combined, pre-offset index stream: one DMA per grid step -------------------
    sent_f = sentences.reshape(-1)
    p1_f = poses1.reshape(-1) + vc
    p2_f = poses2.reshape(-1) + vc + vp
    gidx = jnp.stack([sent_f, p1_f, p2_f], axis=1)              # [N, 3] int32
    gidx = jnp.pad(gidx, ((0, n_pad_tokens - N), (0, 0)))       # pad tokens -> row 0
    slot_off = (jnp.arange(pack, dtype=jnp.int32) * vtot_pad)[None, :, None]
    gidx = (gidx.reshape(n_rows, pack, 3) + slot_off).reshape(n_rows, 3 * pack)

    # ---- explicit, generation-aware VMEM budget --------------------------------------
    est = 4 * (2 * K * out_cols                 # resident table (conservatively x2)
               + 2 * tile_rows * 3 * pack       # double-buffered index tiles
               + 2 * tile_rows * out_cols       # double-buffered output tiles
               + 2 * tile_rows * K)             # multi-hot + matmul staging
    vmem_limit = int(min(max(2 * est, 8 * 2**20), max(cap - 4 * 2**20, 8 * 2**20)))

    out = pl.pallas_call(
        _embedding_kernel,
        out_shape=jax.ShapeDtypeStruct((n_rows, out_cols), jnp.float32),
        grid=(grid,),
        in_specs=[
            pl.BlockSpec((tile_rows, 3 * pack), lambda i: (i, 0)),
            # Constant index_map -> the block-diagonal table is DMA'd once and stays
            # VMEM-resident across the whole grid.
            pl.BlockSpec((K, out_cols), lambda i: (0, 0)),
        ],
        out_specs=pl.BlockSpec((tile_rows, out_cols), lambda i: (i, 0)),
        compiler_params=pltpu.CompilerParams(
            dimension_semantics=("parallel",),
            vmem_limit_bytes=vmem_limit),
    )(gidx, prepared.table)

    # Unpack: [n_rows, pack*slot_stride] -> [n_pad_tokens, E] (row-major, free) -> slice.
    emb = out.reshape(n_rows, pack, slot_stride)[:, :, :E]
    embedds = emb.reshape(n_pad_tokens, E)[:N].reshape(B, L, E)
    return embedds, mask


def init_params(key, char_size, pos_size, char_dim, pos_dim):
    """Deterministic nn.Embedding-style init (N(0,1)), padding_idx=0 row zeroed."""
    k1, k2 = jax.random.split(key)
    char_table = jax.random.normal(k1, (char_size, char_dim), jnp.float32)
    pos_table = jax.random.normal(k2, (pos_size, pos_dim), jnp.float32)
    char_table = char_table.at[0].set(0.0)   # padding_idx=0
    pos_table = pos_table.at[0].set(0.0)     # padding_idx=0
    return char_table, pos_table


if __name__ == "__main__":
    # Small config: char_size=32, pos_size=16, char_dim=32, pos_dim=16 -> E=64 (pack=2).
    B, L_pad = 4, 24
    char_size, pos_size = 32, 16
    char_dim, pos_dim = 32, 16

    key = jax.random.PRNGKey(0)
    k_tab, k_s, k_p1, k_p2 = jax.random.split(key, 4)
    char_table, pos_table = init_params(k_tab, char_size, pos_size, char_dim, pos_dim)

    length_list = [20, 16, 24, 8]
    lengths = jnp.array(length_list, dtype=jnp.int32)
    valid = jnp.arange(L_pad)[None, :] < lengths[:, None]
    sentences = jnp.where(valid, jax.random.randint(k_s, (B, L_pad), 1, char_size), 0).astype(jnp.int32)
    poses1 = jnp.where(valid, jax.random.randint(k_p1, (B, L_pad), 1, pos_size), 0).astype(jnp.int32)
    poses2 = jnp.where(valid, jax.random.randint(k_p2, (B, L_pad), 1, pos_size), 0).astype(jnp.int32)

    # Hoisted table prep: build the block-diagonal lookup table once and reuse it.
    prepared = prepare_embedding_tables(char_table, pos_table)

    # Static max_len computed on the host -> no device sync inside the wrapper.
    max_len = max(length_list)

    # (a) explicit small tile so this tiny demo still exercises a multi-step pipelined,
    #     parallel grid;  (b) default VMEM-budgeted tile sizing (the production path).
    emb_a, mask_a = embedding_forward(sentences, poses1, poses2, lengths,
                                      prepared=prepared, max_len=max_len,
                                      token_tile=32)
    emb_b, mask_b = embedding_forward(sentences, poses1, poses2, lengths,
                                      prepared=prepared, max_len=max_len)
    jax.block_until_ready((emb_a, mask_a, emb_b, mask_b))

    # Pure-JAX reference for validation.
    s_t, p1_t, p2_t = sentences[:, :max_len], poses1[:, :max_len], poses2[:, :max_len]
    ref_emb = jnp.concatenate(
        [char_table[s_t], pos_table[p1_t], pos_table[p2_t]], axis=2)
    ref_mask = (s_t != 0)[:, None, :]

    E = char_dim + 2 * pos_dim
    for emb, mask in ((emb_a, mask_a), (emb_b, mask_b)):
        assert emb.shape == (B, max_len, E)
        assert mask.shape == (B, 1, max_len) and mask.dtype == jnp.bool_
        assert jnp.allclose(emb, ref_emb, atol=1e-6)
        assert jnp.array_equal(mask, ref_mask)

    print("KERNEL_OK")
</pallas_src>

<mosaic_0001>
module attributes {stable_mosaic.version = 11 : i64} {
  func.func @_embedding_kernel(%arg0: i32, %arg1: memref<16x6xi32, #tpu.memory_space<vmem>>, %arg2: memref<256x128xf32, #tpu.memory_space<vmem>>, %arg3: memref<16x128xf32, #tpu.memory_space<vmem>>) attributes {dimension_semantics = [#tpu.dimension_semantics<parallel>], iteration_bounds = array<i64: 3>, scalar_prefetch = 0 : i64, scratch_operands = 0 : i64, tpu.core_type = #tpu.core_type<tc>, window_params = [{transform_indices = @transform_0, window_bounds = array<i64: 16, 6>}, {pipeline_mode = #tpu.pipeline_mode<synchronous>, transform_indices = @transform_1, window_bounds = array<i64: 256, 128>}, {transform_indices = @transform_2, window_bounds = array<i64: 16, 128>}]} {
    %c0 = arith.constant 0 : index
    %c0_0 = arith.constant 0 : index
    %0 = vector.load %arg1[%c0, %c0_0] : memref<16x6xi32, #tpu.memory_space<vmem>>, vector<16x6xi32>
    %1 = tpu.iota {dimensions = array<i32: 1>} : vector<16x256xi32>
    %2 = vector.extract_strided_slice %0 {offsets = [0, 0], sizes = [16, 1], strides = [1, 1]} : vector<16x6xi32> to vector<16x1xi32>
    %3 = vector.broadcast %2 : vector<16x1xi32> to vector<16x256xi32>
    %4 = arith.cmpi eq, %3, %1 : vector<16x256xi32>
    %5 = arith.extui %4 : vector<16x256xi1> to vector<16x256xi32>
    %6 = arith.sitofp %5 : vector<16x256xi32> to vector<16x256xf32>
    %7 = vector.extract_strided_slice %0 {offsets = [0, 1], sizes = [16, 1], strides = [1, 1]} : vector<16x6xi32> to vector<16x1xi32>
    %8 = vector.broadcast %7 : vector<16x1xi32> to vector<16x256xi32>
    %9 = arith.cmpi eq, %8, %1 : vector<16x256xi32>
    %10 = arith.extui %9 : vector<16x256xi1> to vector<16x256xi32>
    %11 = arith.sitofp %10 : vector<16x256xi32> to vector<16x256xf32>
    %12 = arith.addf %6, %11 : vector<16x256xf32>
    %13 = vector.extract_strided_slice %0 {offsets = [0, 2], sizes = [16, 1], strides = [1, 1]} : vector<16x6xi32> to vector<16x1xi32>
    %14 = vector.broadcast %13 : vector<16x1xi32> to vector<16x256xi32>
    %15 = arith.cmpi eq, %14, %1 : vector<16x256xi32>
    %16 = arith.extui %15 : vector<16x256xi1> to vector<16x256xi32>
    %17 = arith.sitofp %16 : vector<16x256xi32> to vector<16x256xf32>
    %18 = arith.addf %12, %17 : vector<16x256xf32>
    %19 = vector.extract_strided_slice %0 {offsets = [0, 3], sizes = [16, 1], strides = [1, 1]} : vector<16x6xi32> to vector<16x1xi32>
    %20 = vector.broadcast %19 : vector<16x1xi32> to vector<16x256xi32>
    %21 = arith.cmpi eq, %20, %1 : vector<16x256xi32>
    %22 = arith.extui %21 : vector<16x256xi1> to vector<16x256xi32>
    %23 = arith.sitofp %22 : vector<16x256xi32> to vector<16x256xf32>
    %24 = arith.addf %18, %23 : vector<16x256xf32>
    %25 = vector.extract_strided_slice %0 {offsets = [0, 4], sizes = [16, 1], strides = [1, 1]} : vector<16x6xi32> to vector<16x1xi32>
    %26 = vector.broadcast %25 : vector<16x1xi32> to vector<16x256xi32>
    %27 = arith.cmpi eq, %26, %1 : vector<16x256xi32>
    %28 = arith.extui %27 : vector<16x256xi1> to vector<16x256xi32>
    %29 = arith.sitofp %28 : vector<16x256xi32> to vector<16x256xf32>
    %30 = arith.addf %24, %29 : vector<16x256xf32>
    %31 = vector.extract_strided_slice %0 {offsets = [0, 5], sizes = [16, 1], strides = [1, 1]} : vector<16x6xi32> to vector<16x1xi32>
    %32 = vector.broadcast %31 : vector<16x1xi32> to vector<16x256xi32>
    %33 = arith.cmpi eq, %32, %1 : vector<16x256xi32>
    %34 = arith.extui %33 : vector<16x256xi1> to vector<16x256xi32>
    %35 = arith.sitofp %34 : vector<16x256xi32> to vector<16x256xf32>
    %36 = arith.addf %30, %35 : vector<16x256xf32>
    %c0_1 = arith.constant 0 : index
    %c0_2 = arith.constant 0 : index
    %37 = vector.load %arg2[%c0_1, %c0_2] : memref<256x128xf32, #tpu.memory_space<vmem>>, vector<256x128xf32>
    %cst = arith.constant dense<0.000000e+00> : vector<16x128xf32>
    %38 = tpu.matmul %36, %37, %cst {dimension_numbers = #tpu.dot_dimension_numbers<[1], [0], [0], [1], [0, 0, 1, 1], [], []>} : vector<16x256xf32>, vector<256x128xf32>, vector<16x128xf32> -> vector<16x128xf32>
    %c0_3 = arith.constant 0 : index
    %c0_4 = arith.constant 0 : index
    %39 = vector.load %arg3[%c0_3, %c0_4] : memref<16x128xf32, #tpu.memory_space<vmem>>, vector<16x128xf32>
    tpu.vector_store %arg3[%c0_3, %c0_4], %38 {strides = array<i32>} : memref<16x128xf32, #tpu.memory_space<vmem>>, vector<16x128xf32>,
    return
  }
  func.func @transform_0(%arg0: i32) -> (i32, i32) {
    %c0_i32 = arith.constant 0 : i32
    %c0_i32_0 = arith.constant 0 : i32
    return %arg0, %c0_i32 : i32, i32
  }
  func.func @transform_1(%arg0: i32) -> (i32, i32) {
    %c0_i32 = arith.constant 0 : i32
    %c0_i32_0 = arith.constant 0 : i32
    %c0_i32_1 = arith.constant 0 : i32
    return %c0_i32, %c0_i32_0 : i32, i32
  }
  func.func @transform_2(%arg0: i32) -> (i32, i32) {
    %c0_i32 = arith.constant 0 : i32
    %c0_i32_0 = arith.constant 0 : i32
    return %arg0, %c0_i32 : i32, i32
  }
}

</mosaic_0001>

<bundles_post_ra>
// kernel: tpu_custom_call.1
= control target key start
LH: loop header
LB: loop body
LE: loop exit
PB: predicated region body
PF: predicated region fallthrough
CT: control target
= control target key end

     0   :  { %7 = vsyncpa [#allocation3], 0  ;;  %s1023_s0 = inlined_call_operand.vmem [shape: s32[48,6], index: 0, kind: input, shape index: {}]   ;;  %s1024_s1 = inlined_call_operand.hbm [shape: f32[256,128], index: 1, kind: input, shape index: {}]   ;;  %s1025_s2 = inlined_call_operand.hbm [shape: f32[48,128], index: 2, kind: output, shape index: {}]  }
   0x1   :  { %8 = vsyncpa [#allocation4], 0 }
   0x2   :  { %10 = vsyncpa [#allocation4 + $0x1], 0  ;;  %s809_s9 = smov 0   ;;  %s811_s10 = smov 0  }
   0x3   :  { %s813_s11 = smov 0   ;;  %s815_s12 = smov 0  }
   0x4 LB: > { %s830_s13 = sadd.s32 4294967295, %s779_s12   ;;  %s490_s14 = sadd.s32 4294967294, %s779_s12   ;;  %s779_s12 = sphi %s815_s12, %s1041_s12   ;;  %s775_s11 = sphi %s813_s11, %s1040_s11   ;;  %s771_s10 = sphi %s811_s10, %s1039_s10   ;;  %s767_s9 = sphi %s809_s9, %s1038_s9  }
   0x5   : > { %s834_s15 = sadd.s32 1, %s779_s12   ;;  %s70_s16 = sadd.s32 1, %s775_s11 }
   0x6   : > { %s67_s17 = ssub.s32 %s779_s12, %s834_s15  ;;  %p80_p0 = scmp.ne.s32.totalorder %s775_s11, %s771_s10 }
   0x7   : > { %p68_p1 = scmp.eq.s32.totalorder %s67_s17, 0  ;;  %p81_p2 = scmp.eq.s32.totalorder %s830_s13, 2 }
   0x8   : > { %p86_p3 = scmp.ne.s32.totalorder %s771_s10, %s767_s9  ;;  %p87_p4 = scmp.eq.s32.totalorder %s490_s14, 2 }
   0x9   : > { %s845_s18 = scalar_select %p68_p1, %s775_s11, %s70_s16  }
   0xa   : > { %p847_p5 = por %p81_p2, %p80_p0  ;;  %p851_p6 = por %p87_p4, %p86_p3 }
   0xb   : > { %p491_p7 = scmp.ge.s32.totalorder %s779_s12, 1  ;;  %p94_p8 = scmp.lt.s32.totalorder %s779_s12, 4 }
   0xc   : > { %s1029_s19 = scalar_select %p847_p5, 1, 0 }
   0xd   : > { %s1030_s20 = scalar_select %p851_p6, 1, 0 }
   0xe   : > { %p1026_p9 = scmp.eq.s32.totalorder %s830_s13, 0  ;;  %p858_p10 = pnand %p491_p7, %p94_p8 }
   0xf   : > { %s781_s22 = smov [#allocation2]   ;;  %s685_s27 = scalar_lea.hbm %s1024_s1, 4096 }
  0x10   : > { %s1031_s21 = scalar_select %p858_p10, 1, 0 }
  0x11   : > { %s106_s23 = sshll.u32 %s781_s22, 4  ;;  %p621_p11 = pneg %p858_p10  ;;  %s107_s23 = int_to_ptr.vmem [resolvable:$true] %s106_s23 }
  0x12   : > { %p686_p13 = scmp.ne.s32.totalorder %s1024_s1, %s685_s27  ;;  %p692_p3 = scmp.lt.u32.totalorder %s685_s27, %s1024_s1 }
  0x13   : > { %p866_p12 = pnand %p1026_p9, %p621_p11 }
  0x15   : > { %p687_p0 = pneg %p866_p12 }
  0x17   : > { %p688_p1 = pnand %p687_p0, %p686_p13 }
  0x19   : > { %p689_p2 = pneg %p688_p1 }
  0x1b   : > { %p694_p4 = pnand %p692_p3, %p689_p2 }
  0x1d   : > { %697 = shalt.err (!%p694_p4)
}
  0x1e   : > { %s698_s4 = scalar_lea.vmem %s107_s23, 4096  ;;  %p706_p9 = scmp.lt.s32.totalorder %s107_s23, %s107_s23 }
  0x1f   : > { %p699_p7 = scmp.ne.s32.totalorder %s107_s23, %s698_s4  ;;  %p707_p6 = scmp.lt.s32.totalorder %s698_s4, %s698_s4 }
  0x21   : > { %p701_p8 = pnand %p699_p7, %p687_p0  ;;  %p708_p5 = por %p707_p6, %p706_p9 }
  0x23   : > { %p702_p11 = pneg %p701_p8 }
  0x25   : > { %p709_p10 = pnand %p708_p5, %p702_p11 }
  0x27   : > { %712 = shalt.err (!%p709_p10)
}
  0x28   : > { %s782_s5 = smov 128   ;;  %s783_s6 = smov 8  }
  0x29   : > { %624 = dma.hbm_to_vmem [thread:$0]  (!%p866_p12), %s1024_s1, 4096, %s107_s23, [#allocation3], %s782_s5, %s782_s5, %s783_s6  }
  0x2a   : > { %p1033_p13 = scmp.ne.s32.totalorder %s1031_s21, 0 }
  0x2b   : > { %p1034_p1 = scmp.eq.s32.totalorder (!%p1033_p13), %s830_s13, 0 }
  0x2c   : > { %131 = sbr.rel (%p1033_p13) target bundleno = 450 (0x1c2), region = 28 }
  0x33   : > { %758 = dma.done.wait (%p1034_p1), [#allocation3], 4096   ;;  %p1035_p0 = pmov %p1034_p1 }
  0x34   : > { %s497_s14 = sshll.u32 %s830_s13, 1  ;;  %v784_v0 = vmov 1   ;;  %v785_v1 = vmov 0   ;;  %v309_v3 = vld [vmem:[#allocation2 + $0x80] sm:$0xff]  ;;  %v310_v4 = vld [vmem:[#allocation2 + $0x88] sm:$0xff]  ;;  %v311_v10 = vld [vmem:[#allocation2 + $0x90] sm:$0xff]  ;;  %v162_v56 = vlaneseq }
  0x35   : > { %760 = vsyncadd (%p1035_p0), [#allocation3], 4294963200  ;;  %677 = vset.pattern.permute.xlu1 %v784_v0  ;;  %676 = vset.pattern.permute.xlu0 %v785_v1  ;;  %p154_p5 = scmp.lt.s32.totalorder %s497_s14, 5  ;;  %v293_v5 = vld [vmem:[#allocation2] sm:$0xff]  ;;  %v294_v6 = vld [vmem:[#allocation2 + $0x8] sm:$0xff]  ;;  %v567_v8 = vpack.c.bf16 %v310_v4, %v309_v3  ;;  %v786_v19 = vmov 2  }
  0x36   : > { %v569_v9 = vpack.c.bf16 %v294_v6, %v293_v5  ;;  %v312_v11 = vld [vmem:[#allocation2 + $0x98] sm:$0xff]  ;;  %v295_v13 = vld [vmem:[#allocation2 + $0x10] sm:$0xff]  ;;  %v313_v15 = vld [vmem:[#allocation2 + $0xa0] sm:$0xff]  ;;  %v787_v26 = vmov 3   ;;  %v788_v35 = vmov 4   ;;  %v789_v36 = vmov 5  }
  0x37   : > { %s1043_s14 = smov (!%p154_p5, %s497_s14), 5  ;;  %v571_v12 = vpack.c.bf16 %v312_v11, %v311_v10  ;;  %568 = vmatprep.subr.bf16.mxu0 %v567_v8  ;;  %v296_v14 = vld [vmem:[#allocation2 + $0x18] sm:$0xff]  ;;  %599 = vmatprep.subr.bf16.mxu1 %v567_v8  ;;  %v314_v16 = vld [vmem:[#allocation2 + $0xa8] sm:$0xff]  ;;  %v297_v20 = vld [vmem:[#allocation2 + $0x20] sm:$0xff]  ;;  %v912_v57 = vand.u32 127, %v162_v56  ;;  %v790_v1 = vmov 0.0  }
  0x38   : > { %s498_s16 = sshll.u32 %s1043_s14, 3  ;;  %570 = vmatpush3.bf16.msra.mxu0 %v569_v9  ;;  %607 = vmatpush3.bf16.msra.mxu1 %v569_v9  ;;  %v573_v17 = vpack.c.bf16 %v296_v14, %v295_v13  ;;  %v575_v18 = vpack.c.bf16 %v314_v16, %v313_v15  ;;  %v298_v21 = vld [vmem:[#allocation2 + $0x28] sm:$0xff]  ;;  %v315_v22 = vld [vmem:[#allocation2 + $0xb0] sm:$0xff]  ;;  %v316_v23 = vld [vmem:[#allocation2 + $0xb8] sm:$0xff]  ;;  %s150_s23 = sand.u32 1, %s771_s10  }
  0x39   : > { %s157_s21 = scalar_lea.vmem %s1023_s0, %s498_s16  ;;  %572 = vmatprep.subr.bf16.mxu0 %v571_v12  ;;  %600 = vmatprep.subr.bf16.mxu1 %v571_v12  ;;  %v577_v24 = vpack.c.bf16 %v298_v21, %v297_v20  ;;  %v579_v25 = vpack.c.bf16 %v316_v23, %v315_v22  ;;  %v299_v27 = vld [vmem:[#allocation2 + $0x30] sm:$0xff]  ;;  %v300_v28 = vld [vmem:[#allocation2 + $0x38] sm:$0xff]  ;;  %v317_v29 = vld [vmem:[#allocation2 + $0xc0] sm:$0xff]  ;;  %v915_v60 = vadd.s32 128, %v912_v57  ;;  %s496_s24 = sshll.u32 %s150_s23, 4 }
  0x3a   : > { %v896_v2 = vld [vmem:[%s157_s21] sm:$0xff]  ;;  %v900_v7 = vld [vmem:[%s157_s21 + $0x8] sm:$0xff]  ;;  %v581_v31 = vpack.c.bf16 %v300_v28, %v299_v27  ;;  %v319_v37 = vld [vmem:[#allocation2 + $0xd0] sm:$0xff]  ;;  %s152_s25 = scalar_lea.vmem [#allocation5], %s496_s24  ;;  %s528_s27 = sshll.u32 %s830_s13, 8 }
  0x3b   : > { %184 = vperm.xlu1 %677, %v896_v2   ;;  %166 = vperm.xlu0 %676, %v896_v2   ;;  %v318_v30 = vld [vmem:[#allocation2 + $0xc8] sm:$0xff]  ;;  %v301_v33 = vld [vmem:[#allocation2 + $0x40] sm:$0xff]  ;;  %v320_v38 = vld [vmem:[#allocation2 + $0xd8] sm:$0xff]  ;;  %s416_s26 = sshll.u32 %s152_s25, 4  ;;  %s980_s30 = scalar_lea.hbm %s1025_s2, %s528_s27  ;;  %s975_s26 = int_to_ptr.vmem [resolvable:$true] %s416_s26 }
  0x3c   : > { %574 = vmatpush3.bf16.msra.mxu0 %v573_v17  ;;  %608 = vmatpush3.bf16.msra.mxu1 %v573_v17  ;;  %v583_v32 = vpack.c.bf16 %v318_v30, %v317_v29  ;;  %v302_v34 = vld [vmem:[#allocation2 + $0x48] sm:$0xff]  ;;  %v587_v40 = vpack.c.bf16 %v320_v38, %v319_v37  ;;  %v303_v41 = vld [vmem:[#allocation2 + $0x50] sm:$0xff]  ;;  %v304_v42 = vld [vmem:[#allocation2 + $0x58] sm:$0xff]  ;;  %s982_s3 = scalar_lea.sflag [#allocation4], %s150_s23  ;;  %s713_s4 = scalar_lea.vmem %s975_s26, 256 }
  0x3d   : > { %576 = vmatprep.subr.bf16.mxu0 %v575_v18  ;;  %601 = vmatprep.subr.bf16.mxu1 %v575_v18  ;;  %v585_v39 = vpack.c.bf16 %v302_v34, %v301_v33  ;;  %v321_v43 = vld [vmem:[#allocation2 + $0xe0] sm:$0xff]  ;;  %v322_v44 = vld [vmem:[#allocation2 + $0xe8] sm:$0xff]  ;;  %v589_v45 = vpack.c.bf16 %v304_v42, %v303_v41  ;;  %v323_v49 = vld [vmem:[#allocation2 + $0xf0] sm:$0xff]  ;;  %p714_p6 = scmp.ne.s32.totalorder %s975_s26, %s713_s4  ;;  %p1036_p9 = scmp.ne.s32.totalorder %s1029_s19, 0 }
  0x3e   : > { %v591_v46 = vpack.c.bf16 %v322_v44, %v321_v43  ;;  %v305_v47 = vld [vmem:[#allocation2 + $0x60] sm:$0xff]  ;;  %v306_v48 = vld [vmem:[#allocation2 + $0x68] sm:$0xff]  ;;  %v324_v50 = vld [vmem:[#allocation2 + $0xf8] sm:$0xff]  ;;  %s791_s13 = smov [#allocation5]  }
  0x3f   : > { %187 = vperm.xlu1 %677, %v900_v7   ;;  %169 = vperm.xlu0 %676, %v900_v7   ;;  %v593_v51 = vpack.c.bf16 %v306_v48, %v305_v47  ;;  %v595_v52 = vpack.c.bf16 %v324_v50, %v323_v49  ;;  %v307_v53 = vld [vmem:[#allocation2 + $0x70] sm:$0xff]  ;;  %v308_v54 = vld [vmem:[#allocation2 + $0x78] sm:$0xff]  ;;  %p715_p10 = pnand %p714_p6, %p1036_p9  ;;  %s717_s5 = sshll.u32 %s791_s13, 4  ;;  %s718_s5 = int_to_ptr.vmem [resolvable:$false] %s717_s5 }
  0x40   : > { %578 = vmatpush3.bf16.msra.mxu0 %v577_v24  ;;  %609 = vmatpush3.bf16.msra.mxu1 %v577_v24  ;;  %v597_v55 = vpack.c.bf16 %v308_v54, %v307_v53  ;;  %s719_s6 = scalar_lea.vmem %s718_s5, 512  ;;  %p720_p2 = scmp.lt.s32.totalorder %s975_s26, %s718_s5 }
  0x41   : > { %580 = vmatprep.subr.bf16.mxu0 %v579_v25  ;;  %602 = vmatprep.subr.bf16.mxu1 %v579_v25  ;;  %p716_p12 = pneg %p715_p10  ;;  %p721_p3 = scmp.lt.s32.totalorder %s719_s6, %s713_s4 }
  0x43   : > { %679 = vset.pattern.permute.xlu1 %v786_v19  ;;  %678 = vset.pattern.permute.xlu0 %v786_v19  ;;  %p722_p4 = por %p721_p3, %p720_p2 }
  0x44   : > { %209 = vperm.xlu1 %679, %v900_v7   ;;  %206 = vperm.xlu0 %678, %v896_v2  }
  0x45   : > { %582 = vmatpush3.bf16.msra.mxu0 %v581_v31  ;;  %610 = vmatpush3.bf16.msra.mxu1 %v581_v31  ;;  %p723_p7 = pnand %p722_p4, %p716_p12 }
  0x46   : > { %584 = vmatprep.subr.bf16.mxu0 %v583_v32  ;;  %603 = vmatprep.subr.bf16.mxu1 %v583_v32 }
  0x48   : > { %680 = vset.pattern.permute.xlu1 %v787_v26  ;;  %681 = vset.pattern.permute.xlu0 %v787_v26 }
  0x49   : > { %228 = vperm.xlu1 %680, %v896_v2   ;;  %231 = vperm.xlu0 %681, %v900_v7  }
  0x4a   : > { %586 = vmatpush3.bf16.msra.mxu0 %v585_v39  ;;  %611 = vmatpush3.bf16.msra.mxu1 %v585_v39 }
  0x4b   : > { %588 = vmatprep.subr.bf16.mxu0 %v587_v40  ;;  %604 = vmatprep.subr.bf16.mxu1 %v587_v40 }
  0x4d   : > { %682 = vset.pattern.permute.xlu1 %v788_v35  ;;  %683 = vset.pattern.permute.xlu0 %v789_v36 }
  0x4e   : > { %250 = vperm.xlu1 %682, %v896_v2   ;;  %272 = vperm.xlu0 %683, %v896_v2  }
  0x4f   : > { %590 = vmatpush3.bf16.msra.mxu0 %v589_v45  ;;  %612 = vmatpush3.bf16.msra.mxu1 %v589_v45 }
  0x50   : > { %592 = vmatprep.subr.bf16.mxu0 %v591_v46  ;;  %605 = vmatprep.subr.bf16.mxu1 %v591_v46 }
  0x52   : > { %253 = vperm.xlu1 %682, %v900_v7  }
  0x53   : > { %594 = vmatpush3.bf16.msra.mxu0 %v593_v51  ;;  %613 = vmatpush3.bf16.msra.mxu1 %v593_v51 }
  0x54   : > { %596 = vmatprep.subr.bf16.mxu0 %v595_v52  ;;  %606 = vmatprep.subr.bf16.mxu1 %v595_v52 }
  0x56   : > { %684 = vset.pattern.permute.xlu1 %v789_v36 }
  0x57   : > { %275 = vperm.xlu1 %684, %v900_v7   ;;  %598 = vmatpush3.bf16.msra.mxu0 %v597_v55 }
  0x58   : > { %614 = vmatpush3.bf16.msra.mxu1 %v597_v55 }
  0xba   : > { %v185_v58 = vpop.permute.xlu1 %184  ;;  %v167_v59 = vpop.permute.xlu0 %166 }
  0xbb   : > { %vm189_vm0 = vcmp.eq.s32.totalorder %v185_v58, %v912_v57  ;;  %vm190_vm1 = vcmp.eq.s32.totalorder %v185_v58, %v915_v60  ;;  %vm171_vm2 = vcmp.eq.s32.totalorder %v167_v59, %v912_v57  ;;  %vm172_vm3 = vcmp.eq.s32.totalorder %v167_v59, %v915_v60 }
  0xbc   : > { %v503_v2 = vsel %vm189_vm0, 1.0, %v790_v1  ;;  %v504_v3 = vsel %vm190_vm1, 1.0, %v790_v1  ;;  %v499_v4 = vsel %vm171_vm2, 1.0, %v790_v1  ;;  %v500_v5 = vsel %vm172_vm3, 1.0, %v790_v1 }
  0xbd   : > { %v201_v6 = vadd.f32 %v503_v2, %v499_v4  ;;  %v202_v7 = vadd.f32 %v504_v3, %v500_v5 }
  0xbe   : > { %v188_v61 = vpop.permute.xlu1 %187  ;;  %v170_v62 = vpop.permute.xlu0 %169 }
  0xbf   : > { %vm191_vm6 = vcmp.eq.s32.totalorder %v188_v61, %v912_v57  ;;  %vm192_vm7 = vcmp.eq.s32.totalorder %v188_v61, %v915_v60  ;;  %vm173_vm8 = vcmp.eq.s32.totalorder %v170_v62, %v912_v57  ;;  %vm174_vm9 = vcmp.eq.s32.totalorder %v170_v62, %v915_v60 }
  0xc0   : > { %v505_v14 = vsel %vm191_vm6, 1.0, %v790_v1  ;;  %v506_v15 = vsel %vm192_vm7, 1.0, %v790_v1  ;;  %v501_v18 = vsel %vm173_vm8, 1.0, %v790_v1  ;;  %v502_v19 = vsel %vm174_vm9, 1.0, %v790_v1 }
  0xc1   : > { %v203_v32 = vadd.f32 %v505_v14, %v501_v18  ;;  %v204_v33 = vadd.f32 %v506_v15, %v502_v19 }
  0xc3   : > { %v210_v63 = vpop.permute.xlu1 %209  ;;  %v207_v0 = vpop.permute.xlu0 %206 }
  0xc4   : > { %vm211_vm4 = vcmp.eq.s32.totalorder %v207_v0, %v912_v57  ;;  %vm212_vm5 = vcmp.eq.s32.totalorder %v207_v0, %v915_v60  ;;  %vm213_vm12 = vcmp.eq.s32.totalorder %v210_v63, %v912_v57  ;;  %vm214_vm13 = vcmp.eq.s32.totalorder %v210_v63, %v915_v60 }
  0xc5   : > { %v507_v8 = vsel %vm211_vm4, 1.0, %v790_v1  ;;  %v508_v9 = vsel %vm212_vm5, 1.0, %v790_v1  ;;  %v509_v28 = vsel %vm213_vm12, 1.0, %v790_v1  ;;  %v510_v29 = vsel %vm214_vm13, 1.0, %v790_v1 }
  0xc6   : > { %v223_v16 = vadd.f32 %v507_v8, %v201_v6  ;;  %v224_v17 = vadd.f32 %v508_v9, %v202_v7  ;;  %v225_v39 = vadd.f32 %v509_v28, %v203_v32  ;;  %v226_v40 = vadd.f32 %v510_v29, %v204_v33 }
  0xc8   : > { %v229_v10 = vpop.permute.xlu1 %228  ;;  %v232_v11 = vpop.permute.xlu0 %231 }
  0xc9   : > { %vm233_vm10 = vcmp.eq.s32.totalorder %v229_v10, %v912_v57  ;;  %vm234_vm11 = vcmp.eq.s32.totalorder %v229_v10, %v915_v60  ;;  %vm235_vm14 = vcmp.eq.s32.totalorder %v232_v11, %v912_v57  ;;  %vm236_vm15 = vcmp.eq.s32.totalorder %v232_v11, %v915_v60 }
  0xca   : > { %v511_v12 = vsel %vm233_vm10, 1.0, %v790_v1  ;;  %v512_v13 = vsel %vm234_vm11, 1.0, %v790_v1  ;;  %v513_v34 = vsel %vm235_vm14, 1.0, %v790_v1  ;;  %v514_v35 = vsel %vm236_vm15, 1.0, %v790_v1 }
  0xcb   : > { %v245_v20 = vadd.f32 %v511_v12, %v223_v16  ;;  %v246_v21 = vadd.f32 %v512_v13, %v224_v17  ;;  %v247_v43 = vadd.f32 %v513_v34, %v225_v39  ;;  %v248_v44 = vadd.f32 %v514_v35, %v226_v40 }
  0xcd   : > { %v251_v22 = vpop.permute.xlu1 %250  ;;  %v273_v23 = vpop.permute.xlu0 %272 }
  0xce   : > { %vm255_vm0 = vcmp.eq.s32.totalorder %v251_v22, %v912_v57  ;;  %vm256_vm1 = vcmp.eq.s32.totalorder %v251_v22, %v915_v60  ;;  %vm277_vm2 = vcmp.eq.s32.totalorder %v273_v23, %v912_v57  ;;  %vm278_vm3 = vcmp.eq.s32.totalorder %v273_v23, %v915_v60 }
  0xcf   : > { %v515_v24 = vsel %vm255_vm0, 1.0, %v790_v1  ;;  %v516_v25 = vsel %vm256_vm1, 1.0, %v790_v1  ;;  %v519_v26 = vsel %vm277_vm2, 1.0, %v790_v1  ;;  %v520_v27 = vsel %vm278_vm3, 1.0, %v790_v1 }
  0xd0   : > { %v267_v30 = vadd.f32 %v515_v24, %v245_v20  ;;  %v268_v31 = vadd.f32 %v516_v25, %v246_v21 }
  0xd1   : > { %v254_v36 = vpop.permute.xlu1 %253 }
  0xd2   : > { %v289_v37 = vadd.f32 %v519_v26, %v267_v30  ;;  %vm257_vm4 = vcmp.eq.s32.totalorder %v254_v36, %v912_v57  ;;  %vm258_vm5 = vcmp.eq.s32.totalorder %v254_v36, %v915_v60  ;;  %v290_v38 = vadd.f32 %v520_v27, %v268_v31 }
  0xd3   : > { %v517_v41 = vsel %vm257_vm4, 1.0, %v790_v1  ;;  %v518_v42 = vsel %vm258_vm5, 1.0, %v790_v1 }
  0xd4   : > { %389 = vmatprep.mubr.f32.mxu0 %v290_v38  ;;  %v269_v46 = vadd.f32 %v517_v41, %v247_v43  ;;  %v270_v47 = vadd.f32 %v518_v42, %v248_v44 }
  0xd5   : > { %390 = vmatmul.mubr.f32.vlgmr.msra.gmra.mrb[0].mxu0 %v289_v37 }
  0xd6   : > { %v276_v45 = vpop.permute.xlu1 %275 }
  0xd7   : > { %vm279_vm6 = vcmp.eq.s32.totalorder %v276_v45, %v912_v57  ;;  %vm280_vm7 = vcmp.eq.s32.totalorder %v276_v45, %v915_v60 }
  0xd8   : > { %v521_v48 = vsel %vm279_vm6, 1.0, %v790_v1  ;;  %v522_v49 = vsel %vm280_vm7, 1.0, %v790_v1 }
  0xd9   : > { %v291_v50 = vadd.f32 %v521_v48, %v269_v46  ;;  %v292_v51 = vadd.f32 %v522_v49, %v270_v47 }
  0xdb   : > { %394 = vmatprep.mubr.f32.mxu1 %v292_v51 }
  0xdc   : > { %395 = vmatmul.mubr.f32.vlgmr.msra.gmra.mrb[0].mxu1 %v291_v50 }
 0x1a8   : > { %v561_v52 = vpop.f32.mrb[0].mxu0 }
 0x1a9   : > { %v562_v53 = vpop.f32.mrb[1].mxu0 }
 0x1aa   : > { %v563_v54 = vadd.f32 %v562_v53, %v561_v52 }
 0x1ac   : > { %400 = vst [vmem:[%s152_s25] sm:$0xff] %v563_v54 }
 0x1af   : > { %v564_v55 = vpop.f32.mrb[0].mxu1 }
 0x1b0   : > { %v565_v56 = vpop.f32.mrb[1].mxu1 }
 0x1b1   : > { %v566_v57 = vadd.f32 %v565_v56, %v564_v55 }
 0x1b3   : > { %401 = vst [vmem:[%s152_s25 + $0x8] sm:$0xff] %v566_v57 }
 0x1b4   : > { %726 = shalt.err (!%p723_p7)
}
 0x1b5   : > { %s727_s7 = scalar_lea.hbm %s980_s30, 256  ;;  %s731_s16 = scalar_lea.hbm %s1025_s2, 768 }
 0x1b6   : > { %p728_p8 = scmp.ne.s32.totalorder %s980_s30, %s727_s7  ;;  %p732_p1 = scmp.lt.u32.totalorder %s980_s30, %s1025_s2 }
 0x1b7   : > { %p733_p0 = scmp.lt.u32.totalorder %s731_s16, %s727_s7  ;;  %p735_p6 = scmp.lt.u32.totalorder %s727_s7, %s980_s30 }
 0x1b8   : > { %p729_p11 = pnand %p728_p8, %p1036_p9 }
 0x1b9   : > { %p734_p5 = por %p733_p0, %p732_p1 }
 0x1ba   : > { %p730_p13 = pneg %p729_p11 }
 0x1bb   : > { %p736_p10 = por %p735_p6, %p734_p5 }
 0x1bd   : > { %p737_p12 = pnand %p736_p10, %p730_p13 }
 0x1bf   : > { %740 = shalt.err (!%p737_p12)
}
 0x1c0   : > { %s792_s21 = smov 128   ;;  %s793_s23 = smov 8  }
 0x1c1   : > { %619 = dma.vmem_to_hbm [thread:$0]  (%p1036_p9), %s975_s26, 256, %s980_s30, %s982_s3, %s792_s21, %s792_s21, %s793_s23  }
 0x1c2 PF: > { %p631_p2 = scmp.ge.s32.totalorder %s779_s12, 2  ;;  %s431_s24 = sand.u32 1, %s767_s9  }
 0x1c3   : > { %p1037_p3 = scmp.ne.s32.totalorder %s1030_s20, 0  ;;  %s432_s25 = scalar_lea.sflag [#allocation4], %s431_s24 }
 0x1c5   : > { %p626_p4 = pnand %p631_p2, %p1037_p3 }
 0x1c7   : > { %762 = dma.done.wait (!%p626_p4), %s432_s25, 256  }
 0x1c8   : > { %764 = vsyncadd (!%p626_p4), %s432_s25, 4294967040  ;;  %p13_p7 = scmp.ge.s32.totalorder %s834_s15, 5   ;;  %s1038_s9 = smov %s771_s10 }
 0x1c9   : > { %s1039_s10 = smov %s775_s11  ;;  %s1040_s11 = smov %s845_s18 }
 0x1ca   : > { %s1041_s12 = smov %s834_s15  ;;  %15 = sbr.rel (!%p13_p7) target bundleno = 4 (0x4), region = 68 }
 0x1d1   :  { %437 = vsyncpa [#allocation3], 1 }
 0x1d2   :  { %439 = vsyncpa [#allocation3 + $0x1], 1 }
 0x1d3   :  { %440 = vsyncpa [#allocation4], 1 }
 0x1d4   :  { %442 = vsyncpa [#allocation4 + $0x1], 1 }

</bundles_post_ra>
